<compile_context>
chip_gen: v5e
topology: v5e:2x2
jax: 0.10.0
libtpu: 0.0.40
codegen_flags: <defaults>
</compile_context>

<pallas_src>
import jax
import jax.numpy as jnp
from jax.experimental import pallas as pl
from jax.experimental.pallas import tpu as pltpu

_LANE = 128     # last-dim (lane) padding granularity
_SUBLANE = 8    # f32 sublane tile: batch padded to a multiple of this


def _round_up(x, m):
    return (x + m - 1) // m * m


def _make_fused_mlp_kernel(num_layers, douts_pad):
    """Build kernel computing relu(...relu(relu(x@W0+b0)@W1+b1)...) in VMEM."""

    def kernel(*refs):
        # refs = (x, W0..W{L-1}, b_stack, out)
        x_ref = refs[0]
        w_refs = refs[1:1 + num_layers]
        b_ref = refs[1 + num_layers]
        o_ref = refs[2 + num_layers]

        h = x_ref[...].astype(jnp.bfloat16)               # bf16 MXU operand
        for l in range(num_layers):                       # static unroll
            y = jnp.dot(h, w_refs[l][...],
                        preferred_element_type=jnp.float32)   # f32 accumulate
            b = b_ref[l:l + 1, :douts_pad[l]]             # (1, Dout_pad), static slice
            y = jnp.maximum(y + b, 0.0)                   # bias + ReLU in f32 (VPU)
            h = y.astype(jnp.bfloat16) if l + 1 < num_layers else y
        o_ref[...] = h.astype(o_ref.dtype)

    return kernel


def init_mlp_params(key, input_size, hidden_sizes, output_size):
    """PyTorch nn.Linear-style init; returns [(W^T (Din,Dout) f32, b (Dout,) f32)]."""
    params = []
    dims = [input_size] + list(hidden_sizes) + [output_size]
    for i in range(len(dims) - 1):
        din, dout = dims[i], dims[i + 1]
        key, kw, kb = jax.random.split(key, 3)
        bound = 1.0 / (din ** 0.5)
        w_t = jax.random.uniform(kw, (din, dout), jnp.float32, -bound, bound)
        b = jax.random.uniform(kb, (dout,), jnp.float32, -bound, bound)
        params.append((w_t, b))
    return params


def pack_params(raw_params, input_size):
    """Pad params lane-dense (128 multiples), cast weights to bf16, stack biases."""
    dims = [input_size] + [w.shape[1] for w, _ in raw_params]
    dims_pad = [_round_up(d, _LANE) for d in dims]
    max_dout_pad = max(dims_pad[1:])

    weights_pad, biases_pad = [], []
    for i, (w_t, b) in enumerate(raw_params):
        din, dout = w_t.shape
        din_p, dout_p = dims_pad[i], dims_pad[i + 1]
        w_p = jnp.zeros((din_p, dout_p), jnp.float32).at[:din, :dout].set(w_t)
        weights_pad.append(w_p.astype(jnp.bfloat16))
        # Padded bias entries stay 0 so padded output columns are exactly 0.
        biases_pad.append(jnp.zeros((max_dout_pad,), jnp.float32).at[:dout].set(b))
    b_stack = jnp.stack(biases_pad, axis=0)               # (L, max_Dout_pad) f32
    return weights_pad, b_stack, tuple(dims), tuple(dims_pad)


def mlp_feature_extractor(x, packed_params, dropout=0.0):
    """Eval-mode forward pass (dropout layers are identity at inference).

    # TODO(synk): training-mode dropout (pltpu PRNG mask + 1/(1-p) scaling) and
    # the batch_norm=True branch are not implemented; eval semantics only.
    """
    del dropout  # identity in eval mode
    weights_pad, b_stack, dims, dims_pad = packed_params
    num_layers = len(weights_pad)
    B, din = x.shape
    assert din == dims[0]

    B_pad = _round_up(B, _SUBLANE)
    x_pad = jnp.zeros((B_pad, dims_pad[0]), jnp.float32).at[:B, :din].set(
        x.astype(jnp.float32))

    douts_pad = dims_pad[1:]
    out_shape = jax.ShapeDtypeStruct((B_pad, douts_pad[-1]), jnp.float32)

    flops = 2 * B_pad * sum(dims_pad[i] * dims_pad[i + 1]
                            for i in range(num_layers))
    bytes_accessed = (int(x_pad.size) * 4
                      + sum(int(w.size) * 2 for w in weights_pad)
                      + int(b_stack.size) * 4
                      + B_pad * douts_pad[-1] * 4)

    vmem = pl.BlockSpec(memory_space=pltpu.MemorySpace.VMEM)
    out_pad = pl.pallas_call(
        _make_fused_mlp_kernel(num_layers, douts_pad),
        out_shape=out_shape,
        in_specs=[vmem] * (num_layers + 2),   # x, W0..W{L-1}, b_stack
        out_specs=vmem,
        cost_estimate=pl.CostEstimate(
            flops=int(flops), transcendentals=0,
            bytes_accessed=int(bytes_accessed)),
    )(x_pad, *weights_pad, b_stack)

    # Strip batch/feature padding.
    return out_pad[:B, :dims[-1]]


if __name__ == "__main__":
    # Small shapes consistent with the module.
    batch = 8
    input_size = 32
    hidden_sizes = [64, 32]
    output_size = 16
    dropout = 0.2  # identity at inference

    key = jax.random.PRNGKey(0)
    key, kx = jax.random.split(key)
    x = jax.random.normal(kx, (batch, input_size), jnp.float32)

    raw_params = init_mlp_params(key, input_size, hidden_sizes, output_size)
    packed = pack_params(raw_params, input_size)

    out = mlp_feature_extractor(x, packed, dropout=dropout)
    out = jax.block_until_ready(out)

    # Pure-JAX reference mirroring the kernel math (bf16 matmul operands,
    # f32 accumulation, bias + ReLU in f32) on the UNPADDED parameters.
    h = x
    for w_t, b in raw_params:
        y = jnp.dot(h.astype(jnp.bfloat16), w_t.astype(jnp.bfloat16),
                    preferred_element_type=jnp.float32)
        h = jnp.maximum(y + b[None, :], 0.0)
    ref = h

    assert out.shape == (batch, output_size)
    max_err = float(jnp.max(jnp.abs(out - ref)))
    assert jnp.allclose(out, ref, atol=1e-2, rtol=1e-2), max_err

    print("KERNEL_OK")
</pallas_src>

<mosaic_0001>
module attributes {stable_mosaic.version = 11 : i64} {
  func.func @kernel(%arg0: memref<8x128xf32, #tpu.memory_space<vmem>>, %arg1: memref<128x128xbf16, #tpu.memory_space<vmem>>, %arg2: memref<128x128xbf16, #tpu.memory_space<vmem>>, %arg3: memref<128x128xbf16, #tpu.memory_space<vmem>>, %arg4: memref<3x128xf32, #tpu.memory_space<vmem>>, %arg5: memref<8x128xf32, #tpu.memory_space<vmem>>) attributes {dimension_semantics = [], scalar_prefetch = 0 : i64, scratch_operands = 0 : i64, tpu.core_type = #tpu.core_type<tc>} {
    %c0 = arith.constant 0 : index
    %c0_0 = arith.constant 0 : index
    %0 = vector.load %arg0[%c0, %c0_0] : memref<8x128xf32, #tpu.memory_space<vmem>>, vector<8x128xf32>
    %1 = arith.truncf %0 : vector<8x128xf32> to vector<8x128xbf16>
    %c0_1 = arith.constant 0 : index
    %c0_2 = arith.constant 0 : index
    %2 = vector.load %arg1[%c0_1, %c0_2] : memref<128x128xbf16, #tpu.memory_space<vmem>>, vector<128x128xbf16>
    %cst = arith.constant dense<0.000000e+00> : vector<8x128xf32>
    %3 = tpu.matmul %1, %2, %cst {dimension_numbers = #tpu.dot_dimension_numbers<[1], [0], [0], [1], [0, 0, 1, 1], [], []>} : vector<8x128xbf16>, vector<128x128xbf16>, vector<8x128xf32> -> vector<8x128xf32>
    %c0_3 = arith.constant 0 : index
    %c0_4 = arith.constant 0 : index
    %4 = vector.load %arg4[%c0_3, %c0_4] : memref<3x128xf32, #tpu.memory_space<vmem>>, vector<1x128xf32>
    %5 = vector.broadcast %4 : vector<1x128xf32> to vector<8x128xf32>
    %6 = arith.addf %3, %5 : vector<8x128xf32>
    %cst_5 = arith.constant 0.000000e+00 : f32
    %7 = vector.broadcast %cst_5 : f32 to vector<8x128xf32>
    %8 = arith.maximumf %6, %7 : vector<8x128xf32>
    %9 = arith.truncf %8 : vector<8x128xf32> to vector<8x128xbf16>
    %c0_6 = arith.constant 0 : index
    %c0_7 = arith.constant 0 : index
    %10 = vector.load %arg2[%c0_6, %c0_7] : memref<128x128xbf16, #tpu.memory_space<vmem>>, vector<128x128xbf16>
    %cst_8 = arith.constant dense<0.000000e+00> : vector<8x128xf32>
    %11 = tpu.matmul %9, %10, %cst_8 {dimension_numbers = #tpu.dot_dimension_numbers<[1], [0], [0], [1], [0, 0, 1, 1], [], []>} : vector<8x128xbf16>, vector<128x128xbf16>, vector<8x128xf32> -> vector<8x128xf32>
    %c1 = arith.constant 1 : index
    %c0_9 = arith.constant 0 : index
    %12 = vector.load %arg4[%c1, %c0_9] : memref<3x128xf32, #tpu.memory_space<vmem>>, vector<1x128xf32>
    %13 = vector.broadcast %12 : vector<1x128xf32> to vector<8x128xf32>
    %14 = arith.addf %11, %13 : vector<8x128xf32>
    %cst_10 = arith.constant 0.000000e+00 : f32
    %15 = vector.broadcast %cst_10 : f32 to vector<8x128xf32>
    %16 = arith.maximumf %14, %15 : vector<8x128xf32>
    %17 = arith.truncf %16 : vector<8x128xf32> to vector<8x128xbf16>
    %c0_11 = arith.constant 0 : index
    %c0_12 = arith.constant 0 : index
    %18 = vector.load %arg3[%c0_11, %c0_12] : memref<128x128xbf16, #tpu.memory_space<vmem>>, vector<128x128xbf16>
    %cst_13 = arith.constant dense<0.000000e+00> : vector<8x128xf32>
    %19 = tpu.matmul %17, %18, %cst_13 {dimension_numbers = #tpu.dot_dimension_numbers<[1], [0], [0], [1], [0, 0, 1, 1], [], []>} : vector<8x128xbf16>, vector<128x128xbf16>, vector<8x128xf32> -> vector<8x128xf32>
    %c2 = arith.constant 2 : index
    %c0_14 = arith.constant 0 : index
    %20 = vector.load %arg4[%c2, %c0_14] : memref<3x128xf32, #tpu.memory_space<vmem>>, vector<1x128xf32>
    %21 = vector.broadcast %20 : vector<1x128xf32> to vector<8x128xf32>
    %22 = arith.addf %19, %21 : vector<8x128xf32>
    %cst_15 = arith.constant 0.000000e+00 : f32
    %23 = vector.broadcast %cst_15 : f32 to vector<8x128xf32>
    %24 = arith.maximumf %22, %23 : vector<8x128xf32>
    %c0_16 = arith.constant 0 : index
    %c0_17 = arith.constant 0 : index
    %25 = vector.load %arg5[%c0_16, %c0_17] : memref<8x128xf32, #tpu.memory_space<vmem>>, vector<8x128xf32>
    tpu.vector_store %arg5[%c0_16, %c0_17], %24 {strides = array<i32>} : memref<8x128xf32, #tpu.memory_space<vmem>>, vector<8x128xf32>,
    return
  }
}

</mosaic_0001>

<bundles_post_ra>
// kernel: tpu_custom_call.1
= control target key start
LH: loop header
LB: loop body
LE: loop exit
PB: predicated region body
PF: predicated region fallthrough
CT: control target
= control target key end

     0   :  { %10 = vsyncpa [#allocation3], 0  ;;  %s698_s0 = inlined_call_operand.hbm [shape: f32[8,128], index: 0, kind: input, shape index: {}]   ;;  %s699_s1 = inlined_call_operand.hbm [shape: bf16[128,128], index: 1, kind: input, shape index: {}]   ;;  %s700_s2 = inlined_call_operand.hbm [shape: bf16[128,128], index: 2, kind: input, shape index: {}]   ;;  %s701_s3 = inlined_call_operand.hbm [shape: bf16[128,128], index: 3, kind: input, shape index: {}]   ;;  %s702_s4 = inlined_call_operand.hbm [shape: f32[3,128], index: 4, kind: input, shape index: {}]   ;;  %s703_s5 = inlined_call_operand.hbm [shape: f32[8,128], index: 5, kind: output, shape index: {}]  }
   0x1   :  { %11 = vsyncpa [#allocation6], 0 }
   0x2   :  { %12 = vsyncpa [#allocation9], 0  ;;  %s29_s20 = sshll.u32 %s699_s1, 4  ;;  %s30_s20 = int_to_ptr.hbm [resolvable:$true] %s29_s20 }
   0x3   :  { %13 = vsyncpa [#allocation4], 0  ;;  %s642_s21 = smov [#allocation5]   ;;  %s55_s25 = sshll.u32 %s701_s3, 4  ;;  %s56_s25 = int_to_ptr.hbm [resolvable:$true] %s55_s25 }
   0x4   :  { %s31_s22 = sshll.u32 %s642_s21, 4  ;;  %s643_s26 = smov 64   ;;  %s32_s22 = int_to_ptr.vmem [resolvable:$true] %s31_s22 }
   0x5   :  { %s644_s27 = smov 4   ;;  %s645_s28 = smov [#allocation8]  }
   0x6   :  { %37 = dma.hbm_to_vmem [thread:$0]  %s30_s20, 1024, %s32_s22, [#allocation6], %s643_s26, %s643_s26, %s644_s27  }
   0x7   :  { %s57_s29 = sshll.u32 %s645_s28, 4  ;;  %s19_s7 = sshll.u32 %s698_s0, 4  ;;  %s58_s29 = int_to_ptr.vmem [resolvable:$true] %s57_s29  ;;  %s20_s7 = int_to_ptr.hbm [resolvable:$true] %s19_s7 }
   0x8   :  { %63 = dma.hbm_to_vmem [thread:$0]  %s56_s25, 1024, %s58_s29, [#allocation9], %s643_s26, %s643_s26, %s644_s27  }
   0x9   :  { %s42_s9 = sshll.u32 %s700_s2, 4  ;;  %s646_s10 = smov [#allocation2]   ;;  %s43_s9 = int_to_ptr.hbm [resolvable:$true] %s42_s9 }
   0xa   :  { %s21_s11 = sshll.u32 %s646_s10, 4  ;;  %s647_s3 = smov [#allocation7]   ;;  %s22_s11 = int_to_ptr.vmem [resolvable:$true] %s21_s11 }
   0xb   :  { %24 = dma.hbm_to_vmem [thread:$0]  %s20_s7, 128, %s22_s11, [#allocation3]  }
   0xc   :  { %s44_s12 = sshll.u32 %s647_s3, 4  ;;  %s69_s15 = sshll.u32 %s702_s4, 4  ;;  %s45_s12 = int_to_ptr.vmem [resolvable:$true] %s44_s12  ;;  %s70_s15 = int_to_ptr.hbm [resolvable:$true] %s69_s15 }
   0xd   :  { %50 = dma.hbm_to_vmem [thread:$0]  %s43_s9, 1024, %s45_s12, [#allocation6], %s643_s26, %s643_s26, %s644_s27  }
   0xe   :  { %s648_s0 = smov [#allocation10]  }
   0xf   :  { %s71_s16 = sshll.u32 %s648_s0, 4  ;;  %s72_s16 = int_to_ptr.vmem [resolvable:$true] %s71_s16 }
  0x10   :  { %74 = dma.hbm_to_vmem [thread:$0]  %s70_s15, 64, %s72_s16, [#allocation9]  }
  0x11   :  { %634 = dma.done.wait [#allocation3], 128  }
  0x12   :  { %635 = vsyncadd [#allocation3], 4294967168 }
  0x13   :  { %636 = dma.done.wait [#allocation6], 2048  }
  0x14   :  { %637 = vsyncadd [#allocation6], 4294965248 }
  0x15   :  { %638 = dma.done.wait [#allocation9], 1088  }
  0x16   :  { %639 = vsyncadd [#allocation9], 4294966208  ;;  %v462_v0 = vld [vmem:[#allocation5 + $0x38] sm:$0xff]  ;;  %v461_v1 = vld [vmem:[#allocation5 + $0x30] sm:$0xff]  ;;  %s649_s2 = smov [#allocation11]   ;;  %s347_s19 = sshll.u32 %s703_s5, 4  ;;  %s348_s19 = int_to_ptr.hbm [resolvable:$true] %s347_s19 }
  0x17   :  { %163 = vmatpush.bf16.msra.mxu0 %v462_v0  ;;  %v470_v2 = vld [vmem:[#allocation7 + $0x38] sm:$0xff]  ;;  %v469_v3 = vld [vmem:[#allocation7 + $0x30] sm:$0xff]  ;;  %v460_v4 = vld [vmem:[#allocation5 + $0x28] sm:$0xff]  ;;  %s345_s4 = sshll.u32 %s649_s2, 4  ;;  %s346_s4 = int_to_ptr.vmem [resolvable:$true] %s345_s4 }
  0x18   :  { %244 = vmatpush.bf16.msra.mxu1 %v470_v2  ;;  %v468_v5 = vld [vmem:[#allocation7 + $0x28] sm:$0xff]  ;;  %v459_v6 = vld [vmem:[#allocation5 + $0x20] sm:$0xff]  ;;  %v458_v8 = vld [vmem:[#allocation5 + $0x18] sm:$0xff] }
  0x19   :  { %v467_v7 = vld [vmem:[#allocation7 + $0x20] sm:$0xff]  ;;  %v466_v9 = vld [vmem:[#allocation7 + $0x18] sm:$0xff]  ;;  %v457_v10 = vld [vmem:[#allocation5 + $0x10] sm:$0xff] }
  0x1a   :  { %v465_v11 = vld [vmem:[#allocation7 + $0x10] sm:$0xff]  ;;  %v456_v12 = vld [vmem:[#allocation5 + $0x8] sm:$0xff]  ;;  %v455_v13 = vld [vmem:[#allocation5] sm:$0xff] }
  0x1b   :  { %164 = vmatpush.bf16.msra.mxu0 %v461_v1  ;;  %v95_v14 = vld [vmem:[#allocation2] sm:$0xff]  ;;  %v464_v16 = vld [vmem:[#allocation7 + $0x8] sm:$0xff]  ;;  %v463_v17 = vld [vmem:[#allocation7] sm:$0xff] }
  0x1c   :  { %245 = vmatpush.bf16.msra.mxu1 %v469_v3  ;;  %v96_v15 = vpack.c.bf16 %v95_v14, %v95_v14  ;;  %v478_v18 = vld [vmem:[#allocation8 + $0x38] sm:$0xff]  ;;  %v477_v19 = vld [vmem:[#allocation8 + $0x30] sm:$0xff]  ;;  %v476_v20 = vld [vmem:[#allocation8 + $0x28] sm:$0xff] }
  0x1d   :  { %325 = vmatpush.bf16.msra.mxu2 %v478_v18  ;;  %v475_v21 = vld [vmem:[#allocation8 + $0x20] sm:$0xff]  ;;  %v474_v22 = vld [vmem:[#allocation8 + $0x18] sm:$0xff]  ;;  %v473_v23 = vld [vmem:[#allocation8 + $0x10] sm:$0xff] }
  0x1e   :  { %v487_v24 = vld [vmem:[#allocation10] ss:$0 sm:$0xff]  ;;  %v472_v30 = vld [vmem:[#allocation8 + $0x8] sm:$0xff]  ;;  %v488_v32 = vld [vmem:[#allocation10 + $0x1] ss:$0 sm:$0xff] }
  0x1f   :  { %165 = vmatpush.bf16.msra.mxu0 %v460_v4  ;;  %v471_v31 = vld [vmem:[#allocation8] sm:$0xff] }
  0x20   :  { %246 = vmatpush.bf16.msra.mxu1 %v468_v5  ;;  %v489_v38 = vld [vmem:[#allocation10 + $0x2] ss:$0 sm:$0xff] }
  0x21   :  { %326 = vmatpush.bf16.msra.mxu2 %v477_v19 }
  0x23   :  { %166 = vmatpush.bf16.msra.mxu0 %v459_v6 }
  0x24   :  { %247 = vmatpush.bf16.msra.mxu1 %v467_v7 }
  0x25   :  { %327 = vmatpush.bf16.msra.mxu2 %v476_v20 }
  0x27   :  { %167 = vmatpush.bf16.msra.mxu0 %v458_v8 }
  0x28   :  { %248 = vmatpush.bf16.msra.mxu1 %v466_v9 }
  0x29   :  { %328 = vmatpush.bf16.msra.mxu2 %v475_v21 }
  0x2b   :  { %168 = vmatpush.bf16.msra.mxu0 %v457_v10 }
  0x2c   :  { %249 = vmatpush.bf16.msra.mxu1 %v465_v11 }
  0x2d   :  { %329 = vmatpush.bf16.msra.mxu2 %v474_v22 }
  0x2f   :  { %169 = vmatpush.bf16.msra.mxu0 %v456_v12 }
  0x30   :  { %250 = vmatpush.bf16.msra.mxu1 %v464_v16 }
  0x31   :  { %330 = vmatpush.bf16.msra.mxu2 %v473_v23 }
  0x33   :  { %170 = vmatpush.bf16.msra.mxu0 %v455_v13 }
  0x34   :  { %251 = vmatpush.bf16.msra.mxu1 %v463_v17 }
  0x35   :  { %331 = vmatpush.bf16.msra.mxu2 %v472_v30 }
  0x36   :  { %171 = vmatmul.bf16.vlgmr.msra.gmra.mxu0 %v96_v15 }
  0x39   :  { %332 = vmatpush.bf16.msra.mxu2 %v471_v31 }
  0xb3   :  { %v172_v25 = vpop.f32.mrf.mxu0 }
  0xb4   :  { %v173_v26 = vadd.f32 %v487_v24, %v172_v25 }
  0xb6   :  { %v176_v27 = vmax.f32 %v173_v26, 0.0 }
  0xb8   :  { %v177_v28 = vpack.c.bf16 %v176_v27, %v176_v27 }
  0xba   :  { %252 = vmatmul.bf16.vlgmr.msra.gmra.mxu1 %v177_v28 }
  0xbb   :  { %v174_v29 = vpop.f32.mrf.mxu0 }
 0x137   :  { %v253_v33 = vpop.f32.mrf.mxu1 }
 0x138   :  { %v254_v34 = vadd.f32 %v488_v32, %v253_v33 }
 0x13a   :  { %v257_v35 = vmax.f32 %v254_v34, 0.0 }
 0x13c   :  { %v258_v36 = vpack.c.bf16 %v257_v35, %v257_v35 }
 0x13e   :  { %333 = vmatmul.bf16.vlgmr.msra.gmra.mxu2 %v258_v36 }
 0x13f   :  { %v255_v37 = vpop.f32.mrf.mxu1 }
 0x1c1   :  { %v334_v39 = vpop.f32.mrf.mxu2 }
 0x1c2   :  { %v335_v40 = vadd.f32 %v489_v38, %v334_v39 }
 0x1c4   :  { %v338_v41 = vmax.f32 %v335_v40, 0.0 }
 0x1c6   :  { %339 = vst [vmem:[#allocation11] sm:$0xff] %v338_v41 }
 0x1c7   :  { %350 = dma.vmem_to_hbm [thread:$0]  %s346_s4, 128, %s348_s19, [#allocation4]  }
 0x1c9   :  { %v336_v42 = vpop.f32.mrf.mxu2 }
 0x1ca   :  { %640 = dma.done.wait [#allocation4], 128  }
 0x1cb   :  { %641 = vsyncadd [#allocation4], 4294967168 }
 0x1cc   :  { %355 = vsyncpa [#allocation3], 1 }
 0x1cd   :  { %356 = vsyncpa [#allocation6], 1 }
 0x1ce   :  { %357 = vsyncpa [#allocation9], 1 }
 0x1cf   :  { %358 = vsyncpa [#allocation4], 1 }

</bundles_post_ra>
